<compile_context>
chip_gen: v7x
topology: tpu7x:2x2x1
jax: 0.10.0
libtpu: 0.0.40
codegen_flags: <defaults>
</compile_context>

<pallas_src>
import functools

import numpy as np
import jax
import jax.numpy as jnp
from jax.experimental import pallas as pl
from jax.experimental.pallas import tpu as pltpu


def _haar_col_matrix(wt: int) -> np.ndarray:
    """(Wt, Wt) column-combine matrix, entries in {-1, 0, +1} (bf16-exact).

    For a row vector v of Wt interleaved columns:
      (v @ M)[:Wto] = v[0::2] + v[1::2]   (sum  -> LL / LH)
      (v @ M)[Wto:] = v[1::2] - v[0::2]   (diff -> HL / HH)
    """
    wto = wt // 2
    m = np.zeros((wt, wt), np.float32)
    j = np.arange(wto)
    m[2 * j, j] = 1.0
    m[2 * j + 1, j] = 1.0
    m[2 * j, wto + j] = -1.0
    m[2 * j + 1, wto + j] = 1.0
    return m


def _pick_w_tile(W: int) -> int:
    # Wt = 256 keeps the MXU contraction at 256 and band stores 128-lane
    # aligned (Wto = 128); otherwise use the full width (matrix still only
    # W^2 * 2 bytes in bf16, 4x smaller than v1's (2W, 4Wh) f32 matrix).
    if W > 256 and W % 256 == 0:
        return 256
    # TODO(synk): very large W not divisible by 256 still gets one (W, W)
    # matrix tile; a padded/masked lane tiling would cover that case too.
    return W


def _pick_row_tile(rows: int, wt: int, itemsize: int, sublane: int) -> int:
    """Row tile: ~1 MiB input block, sublane-aligned, robust to awkward rows."""
    target = 1 << 20
    cap = max(sublane, (target // max(1, wt * itemsize)) // sublane * sublane)
    if rows <= cap:
        return rows
    d = cap
    while d >= sublane:
        if rows % d == 0:
            return d
        d -= sublane
    # No nice divisor: use a cdiv grid; the masked remainder rows are safe
    # because the whole transform is row-independent.
    return cap


def _split_dot(a_f32, m_bf16, n_pieces: int):
    """(a @ m) via `n_pieces` single-pass bf16 MXU matmuls.

    m is exactly representable in bf16, so splitting `a` into bf16 pieces and
    summing the piecewise products reproduces the f32 product to ~2^-24
    relative (3 pieces) -- the cost of precision=HIGH, accuracy of HIGHEST.
    """
    acc = None
    rem = a_f32
    for i in range(n_pieces):
        p = rem.astype(jnp.bfloat16)
        y = jnp.dot(p, m_bf16, preferred_element_type=jnp.float32)
        acc = y if acc is None else acc + y
        if i + 1 < n_pieces:
            rem = rem - p.astype(jnp.float32)
    return acc


def _dwt_core(xe, xo, m, o_ref, n_pieces):
    # Row (H) even/odd combine on the VPU -- exact in f32.
    s = (xe + xo) * 0.5          # cols 2j: x1+x2, cols 2j+1: x3+x4
    d = xo - s                   # cols 2j: x2-x1, cols 2j+1: x4-x3
    wto = o_ref.shape[-1]
    ys = _split_dot(s, m, n_pieces)   # [:, :wto] = LL, [:, wto:] = HL
    yd = _split_dot(d, m, n_pieces)   # [:, :wto] = LH, [:, wto:] = HH
    o_ref[0] = ys[:, :wto].astype(o_ref.dtype)
    o_ref[1] = ys[:, wto:].astype(o_ref.dtype)
    o_ref[2] = yd[:, :wto].astype(o_ref.dtype)
    o_ref[3] = yd[:, wto:].astype(o_ref.dtype)


def _dwt_kernel_fused(x_ref, m_ref, o_ref, *, n_pieces):
    # x_ref: (tR, 2W), lanes [0,W) = even H-row, [W,2W) = odd H-row.
    x = x_ref[...].astype(jnp.float32)
    w = x.shape[-1] // 2
    _dwt_core(x[:, :w], x[:, w:], m_ref[...], o_ref, n_pieces)


def _dwt_kernel_split(xe_ref, xo_ref, m_ref, o_ref, *, n_pieces):
    # xe_ref / xo_ref: (tR, Wt) even / odd H-row columns of one W tile.
    _dwt_core(xe_ref[...].astype(jnp.float32),
              xo_ref[...].astype(jnp.float32),
              m_ref[...], o_ref, n_pieces)


@jax.jit
def dwt(x):
    """Pallas TPU equivalent of DWT.forward / dwt_init: (B,C,H,W) -> (B,4C,H/2,W/2)."""
    B, C, H, W = x.shape
    assert H % 2 == 0 and W % 2 == 0, "DWT requires even H and W"
    Hh, Wh = H // 2, W // 2
    rows = C * Hh
    itemsize = jnp.dtype(x.dtype).itemsize
    sublane = {4: 8, 2: 16, 1: 32}.get(itemsize, 8)

    wt = _pick_w_tile(W)
    wto = wt // 2
    n_w = W // wt
    tR = _pick_row_tile(rows, wt, itemsize, sublane)
    n_r = pl.cdiv(rows, tR)
    # f32 needs 3 bf16 pieces for an (effectively) exact product; 16-bit
    # inputs only need 2.
    n_pieces = 2 if itemsize == 2 else 3

    # Free (no data movement) view: (B, C, H, W) -> (B, C*Hh, 2*W);
    # lanes [0, W) hold the even H-row, [W, 2W) the odd H-row of each pair.
    x3 = x.reshape(B, rows, 2 * W)
    m = jnp.asarray(_haar_col_matrix(wt), dtype=jnp.bfloat16)

    m_spec = pl.BlockSpec((wt, wt), lambda b, r, w: (0, 0))
    if W % 128 == 0:
        # Lane-aligned even/odd blocks: pass the same array twice with two
        # BlockSpecs so the W axis can be tiled (even block at lane-block w,
        # odd block at lane-block w + n_w).  Total HBM read = array once.
        kernel = functools.partial(_dwt_kernel_split, n_pieces=n_pieces)
        in_specs = [
            pl.BlockSpec((None, tR, wt), lambda b, r, w: (b, r, w)),
            pl.BlockSpec((None, tR, wt), lambda b, r, w: (b, r, w + n_w)),
            m_spec,
        ]
        operands = (x3, x3, m)
    else:
        # Small / odd W (e.g. 16): keep the full-lane block (compliant with
        # the (8,128) rule) and split the two halves in-kernel.
        kernel = functools.partial(_dwt_kernel_fused, n_pieces=n_pieces)
        in_specs = [
            pl.BlockSpec((None, tR, 2 * W), lambda b, r, w: (b, r, 0)),
            m_spec,
        ]
        operands = (x3, m)

    flops = 4 * n_pieces * B * rows * W * wt
    bytes_accessed = 2 * B * C * H * W * itemsize + int(m.size) * 2

    out = pl.pallas_call(
        kernel,
        out_shape=jax.ShapeDtypeStruct((B, 4, rows, Wh), x.dtype),
        grid=(B, n_r, n_w),
        in_specs=in_specs,
        out_specs=pl.BlockSpec((None, 4, tR, wto), lambda b, r, w: (b, 0, r, w)),
        compiler_params=pltpu.CompilerParams(
            dimension_semantics=("parallel", "parallel", "parallel"),
            vmem_limit_bytes=40 * 1024 * 1024,
        ),
        cost_estimate=pl.CostEstimate(
            flops=flops, transcendentals=0, bytes_accessed=bytes_accessed),
    )(*operands)

    # (B, 4, C*Hh, Wh) -> (B, 4*C, Hh, Wh): pure dim split/merge (free view),
    # matching torch.cat((LL, HL, LH, HH), dim=1).
    return out.reshape(B, 4 * C, Hh, Wh)


def dwt_ref(x):
    # Pure-JAX reference mirroring the PyTorch dwt_init.
    x01 = x[:, :, 0::2, :] / 2
    x02 = x[:, :, 1::2, :] / 2
    x1 = x01[:, :, :, 0::2]
    x2 = x02[:, :, :, 0::2]
    x3 = x01[:, :, :, 1::2]
    x4 = x02[:, :, :, 1::2]
    x_LL = x1 + x2 + x3 + x4
    x_HL = -x1 - x2 + x3 + x4
    x_LH = -x1 + x2 - x3 + x4
    x_HH = x1 - x2 - x3 + x4
    return jnp.concatenate((x_LL, x_HL, x_LH, x_HH), axis=1)


if __name__ == "__main__":
    key = jax.random.PRNGKey(0)
    x = jax.random.normal(key, (2, 4, 16, 16), dtype=jnp.float32)

    y = dwt(x)
    jax.block_until_ready(y)

    y_ref = dwt_ref(x)
    assert y.shape == (2, 16, 8, 8), y.shape
    err = float(jnp.max(jnp.abs(y - y_ref)))
    assert jnp.allclose(y, y_ref, atol=1e-5, rtol=1e-5), err
    print("KERNEL_OK")
</pallas_src>

<mosaic_0001>
module attributes {stable_mosaic.version = 11 : i64} {
  func.func @_dwt_kernel_fused(%arg0: i32, %arg1: i32, %arg2: i32, %arg3: memref<1x32x32xf32, #tpu.memory_space<vmem>>, %arg4: memref<16x16xbf16, #tpu.memory_space<vmem>>, %arg5: memref<1x4x32x8xf32, #tpu.memory_space<vmem>>) attributes {dimension_semantics = [#tpu.dimension_semantics<parallel>, #tpu.dimension_semantics<parallel>, #tpu.dimension_semantics<parallel>], iteration_bounds = array<i64: 2, 1, 1>, scalar_prefetch = 0 : i64, scratch_operands = 0 : i64, tpu.core_type = #tpu.core_type<tc>, window_params = [{transform_indices = @transform_0, window_bounds = array<i64: 1, 32, 32>}, {pipeline_mode = #tpu.pipeline_mode<synchronous>, transform_indices = @transform_1, window_bounds = array<i64: 16, 16>}, {transform_indices = @transform_2, window_bounds = array<i64: 1, 4, 32, 8>}]} {
    %c0 = arith.constant 0 : index
    %c0_0 = arith.constant 0 : index
    %c0_1 = arith.constant 0 : index
    %0 = vector.load %arg3[%c0, %c0_0, %c0_1] : memref<1x32x32xf32, #tpu.memory_space<vmem>>, vector<1x32x32xf32>
    %1 = vector.shape_cast %0 : vector<1x32x32xf32> to vector<32x32xf32>
    %2 = vector.extract_strided_slice %1 {offsets = [0, 0], sizes = [32, 16], strides = [1, 1]} : vector<32x32xf32> to vector<32x16xf32>
    %3 = vector.extract_strided_slice %1 {offsets = [0, 16], sizes = [32, 16], strides = [1, 1]} : vector<32x32xf32> to vector<32x16xf32>
    %c0_2 = arith.constant 0 : index
    %c0_3 = arith.constant 0 : index
    %4 = vector.load %arg4[%c0_2, %c0_3] : memref<16x16xbf16, #tpu.memory_space<vmem>>, vector<16x16xbf16>
    %5 = arith.addf %2, %3 : vector<32x16xf32>
    %cst = arith.constant 5.000000e-01 : f32
    %6 = vector.broadcast %cst : f32 to vector<32x16xf32>
    %7 = arith.mulf %5, %6 : vector<32x16xf32>
    %8 = arith.subf %3, %7 : vector<32x16xf32>
    %9 = arith.truncf %7 : vector<32x16xf32> to vector<32x16xbf16>
    %cst_4 = arith.constant dense<0.000000e+00> : vector<32x16xf32>
    %10 = tpu.matmul %9, %4, %cst_4 {dimension_numbers = #tpu.dot_dimension_numbers<[1], [0], [0], [1], [0, 0, 1, 1], [], []>} : vector<32x16xbf16>, vector<16x16xbf16>, vector<32x16xf32> -> vector<32x16xf32>
    %11 = arith.extf %9 : vector<32x16xbf16> to vector<32x16xf32>
    %12 = arith.subf %7, %11 : vector<32x16xf32>
    %13 = arith.truncf %12 : vector<32x16xf32> to vector<32x16xbf16>
    %cst_5 = arith.constant dense<0.000000e+00> : vector<32x16xf32>
    %14 = tpu.matmul %13, %4, %cst_5 {dimension_numbers = #tpu.dot_dimension_numbers<[1], [0], [0], [1], [0, 0, 1, 1], [], []>} : vector<32x16xbf16>, vector<16x16xbf16>, vector<32x16xf32> -> vector<32x16xf32>
    %15 = arith.addf %10, %14 : vector<32x16xf32>
    %16 = arith.extf %13 : vector<32x16xbf16> to vector<32x16xf32>
    %17 = arith.subf %12, %16 : vector<32x16xf32>
    %18 = arith.truncf %17 : vector<32x16xf32> to vector<32x16xbf16>
    %cst_6 = arith.constant dense<0.000000e+00> : vector<32x16xf32>
    %19 = tpu.matmul %18, %4, %cst_6 {dimension_numbers = #tpu.dot_dimension_numbers<[1], [0], [0], [1], [0, 0, 1, 1], [], []>} : vector<32x16xbf16>, vector<16x16xbf16>, vector<32x16xf32> -> vector<32x16xf32>
    %20 = arith.addf %15, %19 : vector<32x16xf32>
    %21 = arith.truncf %8 : vector<32x16xf32> to vector<32x16xbf16>
    %cst_7 = arith.constant dense<0.000000e+00> : vector<32x16xf32>
    %22 = tpu.matmul %21, %4, %cst_7 {dimension_numbers = #tpu.dot_dimension_numbers<[1], [0], [0], [1], [0, 0, 1, 1], [], []>} : vector<32x16xbf16>, vector<16x16xbf16>, vector<32x16xf32> -> vector<32x16xf32>
    %23 = arith.extf %21 : vector<32x16xbf16> to vector<32x16xf32>
    %24 = arith.subf %8, %23 : vector<32x16xf32>
    %25 = arith.truncf %24 : vector<32x16xf32> to vector<32x16xbf16>
    %cst_8 = arith.constant dense<0.000000e+00> : vector<32x16xf32>
    %26 = tpu.matmul %25, %4, %cst_8 {dimension_numbers = #tpu.dot_dimension_numbers<[1], [0], [0], [1], [0, 0, 1, 1], [], []>} : vector<32x16xbf16>, vector<16x16xbf16>, vector<32x16xf32> -> vector<32x16xf32>
    %27 = arith.addf %22, %26 : vector<32x16xf32>
    %28 = arith.extf %25 : vector<32x16xbf16> to vector<32x16xf32>
    %29 = arith.subf %24, %28 : vector<32x16xf32>
    %30 = arith.truncf %29 : vector<32x16xf32> to vector<32x16xbf16>
    %cst_9 = arith.constant dense<0.000000e+00> : vector<32x16xf32>
    %31 = tpu.matmul %30, %4, %cst_9 {dimension_numbers = #tpu.dot_dimension_numbers<[1], [0], [0], [1], [0, 0, 1, 1], [], []>} : vector<32x16xbf16>, vector<16x16xbf16>, vector<32x16xf32> -> vector<32x16xf32>
    %32 = arith.addf %27, %31 : vector<32x16xf32>
    %33 = vector.extract_strided_slice %20 {offsets = [0, 0], sizes = [32, 8], strides = [1, 1]} : vector<32x16xf32> to vector<32x8xf32>
    %c0_10 = arith.constant 0 : index
    %c0_11 = arith.constant 0 : index
    %c0_12 = arith.constant 0 : index
    %c0_13 = arith.constant 0 : index
    %34 = vector.load %arg5[%c0_10, %c0_11, %c0_12, %c0_13] : memref<1x4x32x8xf32, #tpu.memory_space<vmem>>, vector<1x1x32x8xf32>
    %35 = vector.shape_cast %34 : vector<1x1x32x8xf32> to vector<32x8xf32>
    %36 = vector.shape_cast %33 : vector<32x8xf32> to vector<1x1x32x8xf32>
    tpu.vector_store %arg5[%c0_10, %c0_11, %c0_12, %c0_13], %36 {strides = array<i32>} : memref<1x4x32x8xf32, #tpu.memory_space<vmem>>, vector<1x1x32x8xf32>,
    %37 = vector.extract_strided_slice %20 {offsets = [0, 8], sizes = [32, 8], strides = [1, 1]} : vector<32x16xf32> to vector<32x8xf32>
    %c0_14 = arith.constant 0 : index
    %c1 = arith.constant 1 : index
    %c0_15 = arith.constant 0 : index
    %c0_16 = arith.constant 0 : index
    %38 = vector.load %arg5[%c0_14, %c1, %c0_15, %c0_16] : memref<1x4x32x8xf32, #tpu.memory_space<vmem>>, vector<1x1x32x8xf32>
    %39 = vector.shape_cast %38 : vector<1x1x32x8xf32> to vector<32x8xf32>
    %40 = vector.shape_cast %37 : vector<32x8xf32> to vector<1x1x32x8xf32>
    tpu.vector_store %arg5[%c0_14, %c1, %c0_15, %c0_16], %40 {strides = array<i32>} : memref<1x4x32x8xf32, #tpu.memory_space<vmem>>, vector<1x1x32x8xf32>,
    %41 = vector.extract_strided_slice %32 {offsets = [0, 0], sizes = [32, 8], strides = [1, 1]} : vector<32x16xf32> to vector<32x8xf32>
    %c0_17 = arith.constant 0 : index
    %c2 = arith.constant 2 : index
    %c0_18 = arith.constant 0 : index
    %c0_19 = arith.constant 0 : index
    %42 = vector.load %arg5[%c0_17, %c2, %c0_18, %c0_19] : memref<1x4x32x8xf32, #tpu.memory_space<vmem>>, vector<1x1x32x8xf32>
    %43 = vector.shape_cast %42 : vector<1x1x32x8xf32> to vector<32x8xf32>
    %44 = vector.shape_cast %41 : vector<32x8xf32> to vector<1x1x32x8xf32>
    tpu.vector_store %arg5[%c0_17, %c2, %c0_18, %c0_19], %44 {strides = array<i32>} : memref<1x4x32x8xf32, #tpu.memory_space<vmem>>, vector<1x1x32x8xf32>,
    %45 = vector.extract_strided_slice %32 {offsets = [0, 8], sizes = [32, 8], strides = [1, 1]} : vector<32x16xf32> to vector<32x8xf32>
    %c0_20 = arith.constant 0 : index
    %c3 = arith.constant 3 : index
    %c0_21 = arith.constant 0 : index
    %c0_22 = arith.constant 0 : index
    %46 = vector.load %arg5[%c0_20, %c3, %c0_21, %c0_22] : memref<1x4x32x8xf32, #tpu.memory_space<vmem>>, vector<1x1x32x8xf32>
    %47 = vector.shape_cast %46 : vector<1x1x32x8xf32> to vector<32x8xf32>
    %48 = vector.shape_cast %45 : vector<32x8xf32> to vector<1x1x32x8xf32>
    tpu.vector_store %arg5[%c0_20, %c3, %c0_21, %c0_22], %48 {strides = array<i32>} : memref<1x4x32x8xf32, #tpu.memory_space<vmem>>, vector<1x1x32x8xf32>,
    return
  }
  func.func @transform_0(%arg0: i32, %arg1: i32, %arg2: i32) -> (i32, i32, i32) {
    %c0_i32 = arith.constant 0 : i32
    %c0_i32_0 = arith.constant 0 : i32
    return %arg0, %arg1, %c0_i32 : i32, i32, i32
  }
  func.func @transform_1(%arg0: i32, %arg1: i32, %arg2: i32) -> (i32, i32) {
    %c0_i32 = arith.constant 0 : i32
    %c0_i32_0 = arith.constant 0 : i32
    %c0_i32_1 = arith.constant 0 : i32
    return %c0_i32, %c0_i32_0 : i32, i32
  }
  func.func @transform_2(%arg0: i32, %arg1: i32, %arg2: i32) -> (i32, i32, i32, i32) {
    %c0_i32 = arith.constant 0 : i32
    %c0_i32_0 = arith.constant 0 : i32
    return %arg0, %c0_i32, %arg1, %arg2 : i32, i32, i32, i32
  }
}

</mosaic_0001>

<bundles_post_ra>
// kernel: dwt.1
= control target key start
LH: loop header
LB: loop body
LE: loop exit
PB: predicated region body
PF: predicated region fallthrough
CT: control target
= control target key end

     0   :  { %s986_s9 = smov 0   ;;  %s988_s10 = smov 0   ;;  %s1119_s0 = inlined_call_operand.vmem [shape: f32[2,32,32], index: 0, kind: input, shape index: {}]   ;;  %s1120_s1 = inlined_call_operand.vmem [shape: bf16[16,16], index: 1, kind: input, shape index: {}]   ;;  %s1121_s2 = inlined_call_operand.vmem [shape: f32[2,4,32,8], index: 2, kind: output, shape index: {}]  }
   0x1   :  { %s990_s11 = smov 0  }
   0x2 LB: > { %s31_s12 = sadd.s32 1, %s962_s10  ;;  %p812_p0 = scmp.ge.s32.totalorder %s966_s11, 1  ;;  %s966_s11 = sphi %s990_s11, %s12_s11   ;;  %s962_s10 = sphi %s988_s10, %s1123_s10   ;;  %s958_s9 = sphi %s986_s9, %s1122_s9  }
   0x3   : > { %p33_p1 = scmp.ge.s32.totalorder %s31_s12, 2  ;;  %p142_p2 = scmp.lt.s32.totalorder %s966_s11, 3 }
   0x5   : > { %s1125_s12 = smov (%p33_p1, %s31_s12), 0  ;;  %p143_p3 = pnand %p812_p0, %p142_p2 }
   0x6   : > { %p176_p4 = scmp.lt.s32.totalorder (!%p143_p3), %s958_s9, 1  ;;  %v1013_v0 = vld [vmem:[%s1120_s1] sm:$0xff] (!%p143_p3)   ;;  %s968_s19 = smov (!%p143_p3), 112   ;;  %vm267_vm0 = vcmask (!%p143_p3), 130048   ;;  %vm656_vm1 = vcmask (!%p143_p3), 64512  }
   0x7   : > { %146 = sbr.rel (%p143_p3) target bundleno = 744 (0x2e8), region = 28  ;;  %864 = vmatprep.subr.bf16.mxu0 (!%p143_p3), %v1013_v0  ;;  %882 = vmatprep.subr.bf16.mxu1 (!%p143_p3), %v1013_v0  ;;  %s969_s20 = smov (!%p143_p3), 16  }
   0x8   : > { %865 = vmatpush3.bf16.msra.mxu0 (!%p143_p3), %v1013_v0  ;;  %883 = vmatpush3.bf16.msra.mxu1 (!%p143_p3), %v1013_v0  ;;  %s970_s25 = smov (!%p143_p3), 120  }
   0x9   : > { %870 = vmatprep.subr.bf16.mxu0 (!%p143_p3), %v1013_v0  ;;  %888 = vmatprep.subr.bf16.mxu1 (!%p143_p3), %v1013_v0 }
   0xe   : > { %s1127_s9 = smov (!%p176_p4, %s958_s9), 1 }
   0xf   : > { %s844_s13 = sshll.u32 %s1127_s9, 5  ;;  %s845_s21 = sshll.u32 %s1127_s9, 7 }
  0x10   : > { %s183_s16 = scalar_lea.vmem %s1119_s0, %s844_s13  ;;  %s1060_s24 = scalar_lea.vmem %s1121_s2, %s845_s21 }
  0x11   : > { %v1015_v1 = vld [vmem:[%s183_s16 + $0x10] sm:$0xff]  ;;  %v1017_v2 = vld [vmem:[%s183_s16] sm:$0xff]  ;;  %v1023_v3 = vld [vmem:[%s183_s16 + $0x18] sm:$0xff] }
  0x12   : > { %213 = vrot.lane.b32.xlu1 %v1015_v1, %s968_s19  ;;  %209 = vrot.lane.b32.xlu0 %v1017_v2, %s968_s19  ;;  %v200_v4 = vld [vmem:[%s183_s16 + $0x8] sm:$0xff] }
  0x16   : > { %215 = vrot.lane.b32.xlu1 %v1023_v3, %s968_s19  ;;  %211 = vrot.lane.b32.xlu0 %v200_v4, %s968_s19 }
  0x84   : > { %v214_v5 = vpop.permute.xlu1 %213  ;;  %v210_v6 = vpop.permute.xlu0 %209 }
  0x85   : > { %v223_v7 = vadd.f32 %v214_v5, %v1015_v1  ;;  %v221_v8 = vadd.f32 %v210_v6, %v1017_v2 }
  0x87   : > { %v225_v9 = vmul.f32 0.5, %v221_v8  ;;  %v227_v12 = vmul.f32 0.5, %v223_v7 }
  0x88   : > { %v216_v10 = vpop.permute.xlu1 %215  ;;  %v212_v11 = vpop.permute.xlu0 %211 }
  0x89   : > { %v224_v13 = vadd.f32 %v216_v10, %v1023_v3  ;;  %v222_v14 = vadd.f32 %v212_v11, %v200_v4  ;;  %233 = vrot.lane.b32.xlu0 %v225_v9, %s969_s20 }
  0x8b   : > { %v228_v15 = vmul.f32 0.5, %v224_v13  ;;  %v226_v16 = vmul.f32 0.5, %v222_v14 }
  0x8d   : > { %v250_v17 = vpack.c.bf16 %v228_v15, %v227_v12  ;;  %v249_v18 = vpack.c.bf16 %v226_v16, %v225_v9  ;;  %237 = vrot.lane.b32.xlu0 %v227_v12, %s969_s20  ;;  %235 = vrot.lane.b32.xlu1 %v226_v16, %s969_s20 }
  0x8f   : > { %v253_v19 = vunpack.c.l.bf16 %v250_v17  ;;  %v254_v20 = vunpack.c.h.bf16 %v250_v17  ;;  %v252_v21 = vunpack.c.h.bf16 %v249_v18  ;;  %v251_v22 = vunpack.c.l.bf16 %v249_v18 }
  0x91   : > { %v257_v23 = vsub.f32 %v227_v12, %v253_v19  ;;  %v258_v24 = vsub.f32 %v228_v15, %v254_v20  ;;  %v256_v25 = vsub.f32 %v226_v16, %v252_v21  ;;  %239 = vrot.lane.b32.xlu1 %v228_v15, %s969_s20  ;;  %v255_v26 = vsub.f32 %v225_v9, %v251_v22 }
  0x93   : > { %v260_v27 = vpack.c.bf16 %v258_v24, %v257_v23  ;;  %v259_v28 = vpack.c.bf16 %v256_v25, %v255_v26 }
  0x95   : > { %866 = vmatprep.mubr.msk.bf16.mxu0 %vm267_vm0, %v259_v28  ;;  %v378_v29 = vunpack.c.l.bf16 %v259_v28  ;;  %v379_v30 = vunpack.c.h.bf16 %v259_v28  ;;  %v380_v34 = vunpack.c.l.bf16 %v260_v27  ;;  %v381_v35 = vunpack.c.h.bf16 %v260_v27 }
  0x96   : > { %867 = vmatmul.mubr.msk.bf16.vlgmr.msra.gmra.mrb[0].mxu0 %vm267_vm0, %v260_v27 }
  0x97   : > { %872 = vmatprep.mubr.msk.bf16.mxu0 %vm267_vm0, %v249_v18  ;;  %871 = vmatpush3.bf16.msra.mxu0 %v1013_v0  ;;  %v382_v31 = vsub.f32 %v255_v26, %v378_v29  ;;  %v383_v32 = vsub.f32 %v256_v25, %v379_v30  ;;  %v384_v36 = vsub.f32 %v257_v23, %v380_v34 }
  0x98   : > { %876 = vmatprep.subr.bf16.mxu0 %v1013_v0  ;;  %v385_v37 = vsub.f32 %v258_v24, %v381_v35 }
  0x99   : > { %v386_v33 = vpack.c.bf16 %v383_v32, %v382_v31 }
  0x9a   : > { %v387_v38 = vpack.c.bf16 %v385_v37, %v384_v36 }
  0xa2   : > { %873 = vmatmul.mubr.msk.bf16.vlgmr.msra.gmra.mrb[0].mxu0 %vm267_vm0, %v250_v17 }
  0xa3   : > { %878 = vmatprep.mubr.msk.bf16.mxu0 %vm267_vm0, %v386_v33  ;;  %877 = vmatpush3.bf16.msra.mxu0 %v1013_v0 }
  0xae   : > { %879 = vmatmul.mubr.msk.bf16.vlgmr.msra.gmra.mrb[0].mxu0 %vm267_vm0, %v387_v38 }
  0xfb   : > { %v234_v39 = vpop.permute.xlu0 %233 }
  0xfc   : > { %v245_v41 = vsub.f32 %v1017_v2, %v234_v39 }
  0xff   : > { %v236_v40 = vpop.permute.xlu1 %235  ;;  %v238_v43 = vpop.permute.xlu0 %237 }
 0x100   : > { %v246_v42 = vsub.f32 %v200_v4, %v236_v40  ;;  %v247_v48 = vsub.f32 %v1015_v1, %v238_v43 }
 0x102   : > { %v447_v44 = vpack.c.bf16 %v246_v42, %v245_v41 }
 0x103   : > { %v240_v45 = vpop.permute.xlu1 %239 }
 0x104   : > { %v449_v46 = vunpack.c.l.bf16 %v447_v44  ;;  %v450_v47 = vunpack.c.h.bf16 %v447_v44  ;;  %v248_v49 = vsub.f32 %v1023_v3, %v240_v45 }
 0x106   : > { %v454_v50 = vsub.f32 %v246_v42, %v450_v47  ;;  %v448_v51 = vpack.c.bf16 %v248_v49, %v247_v48  ;;  %v453_v52 = vsub.f32 %v245_v41, %v449_v46 }
 0x108   : > { %v451_v53 = vunpack.c.l.bf16 %v448_v51  ;;  %v452_v54 = vunpack.c.h.bf16 %v448_v51  ;;  %v457_v55 = vpack.c.bf16 %v454_v50, %v453_v52 }
 0x10a   : > { %v456_v56 = vsub.f32 %v248_v49, %v452_v54  ;;  %461 = vrot.lane.b32.xlu0 %v457_v55, %s968_s19  ;;  %v455_v57 = vsub.f32 %v247_v48, %v451_v53  ;;  %v581_v58 = vunpack.c.l.bf16 %v457_v55  ;;  %v582_v59 = vunpack.c.h.bf16 %v457_v55 }
 0x10c   : > { %v458_v60 = vpack.c.bf16 %v456_v56, %v455_v57  ;;  %v585_v61 = vsub.f32 %v453_v52, %v581_v58  ;;  %v586_v62 = vsub.f32 %v454_v50, %v582_v59 }
 0x10e   : > { %522 = vrot.lane.b32.xlu0 %v447_v44, %s968_s19  ;;  %463 = vrot.lane.b32.xlu1 %v458_v60, %s968_s19  ;;  %v583_v63 = vunpack.c.l.bf16 %v458_v60  ;;  %v584_v1 = vunpack.c.h.bf16 %v458_v60  ;;  %v589_v2 = vpack.c.bf16 %v586_v62, %v585_v61 }
 0x110   : > { %v587_v3 = vsub.f32 %v455_v57, %v583_v63  ;;  %v588_v4 = vsub.f32 %v456_v56, %v584_v1 }
 0x112   : > { %593 = vrot.lane.b32.xlu0 %v589_v2, %s968_s19  ;;  %524 = vrot.lane.b32.xlu1 %v448_v51, %s968_s19  ;;  %v590_v5 = vpack.c.bf16 %v588_v4, %v587_v3 }
 0x116   : > { %595 = vrot.lane.b32.xlu1 %v590_v5, %s968_s19 }
 0x17c   : > { %v462_v6 = vpop.permute.xlu0 %461 }
 0x17d   : > { %884 = vmatprep.mubr.msk.bf16.mxu1 %vm267_vm0, %v462_v6 }
 0x180   : > { %v464_v7 = vpop.permute.xlu1 %463  ;;  %v523_v8 = vpop.permute.xlu0 %522 }
 0x181   : > { %v880_v9 = vpop.f32.mrb[0].mxu0  ;;  %885 = vmatmul.mubr.msk.bf16.vlgmr.msra.gmra.mrb[0].mxu1 %vm267_vm0, %v464_v7 }
 0x182   : > { %659 = vst.msk [vmem:[%s1060_s24 + $0x10] sm:$0xff] %vm656_vm1, %v880_v9  ;;  %889 = vmatpush3.bf16.msra.mxu1 %v1013_v0  ;;  %v428_v10 = vpop.f32.mrb[1].mxu0  ;;  %669 = vrot.lane.b32.xlu0 %v880_v9, %s970_s25 }
 0x183   : > { %657 = vst.msk [vmem:[%s1060_s24] sm:$0xff] %vm656_vm1, %v428_v10  ;;  %890 = vmatprep.mubr.msk.bf16.mxu1 %vm267_vm0, %v523_v8  ;;  %v881_v11 = vpop.f32.mrb[2].mxu0  ;;  %894 = vmatprep.subr.bf16.mxu1 %v1013_v0 }
 0x184   : > { %660 = vst.msk [vmem:[%s1060_s24 + $0x18] sm:$0xff] %vm656_vm1, %v881_v11  ;;  %v431_v12 = vpop.f32.mrb[3].mxu0  ;;  %671 = vrot.lane.b32.xlu1 %v881_v11, %s970_s25  ;;  %v525_v13 = vpop.permute.xlu1 %524 }
 0x185   : > { %658 = vst.msk [vmem:[%s1060_s24 + $0x8] sm:$0xff] %vm656_vm1, %v431_v12  ;;  %v594_v14 = vpop.permute.xlu0 %593 }
 0x186   : > { %665 = vrot.lane.b32.xlu0 %v428_v10, %s970_s25 }
 0x188   : > { %667 = vrot.lane.b32.xlu1 %v431_v12, %s970_s25  ;;  %v596_v15 = vpop.permute.xlu1 %595 }
 0x18d   : > { %891 = vmatmul.mubr.msk.bf16.vlgmr.msra.gmra.mrb[0].mxu1 %vm267_vm0, %v525_v13 }
 0x18e   : > { %895 = vmatpush3.bf16.msra.mxu1 %v1013_v0  ;;  %896 = vmatprep.mubr.msk.bf16.mxu1 %vm267_vm0, %v594_v14 }
 0x199   : > { %897 = vmatmul.mubr.msk.bf16.vlgmr.msra.gmra.mrb[0].mxu1 %vm267_vm0, %v596_v15 }
 0x1f4   : > { %v670_v16 = vpop.permute.xlu0 %669 }
 0x1f5   : > { %832 = vst.msk [vmem:[%s1060_s24 + $0x30] sm:$0xff] %vm656_vm1, %v670_v16 }
 0x1f6   : > { %v672_v17 = vpop.permute.xlu1 %671 }
 0x1f7   : > { %833 = vst.msk [vmem:[%s1060_s24 + $0x38] sm:$0xff] %vm656_vm1, %v672_v17 }
 0x1f8   : > { %v666_v18 = vpop.permute.xlu0 %665 }
 0x1f9   : > { %830 = vst.msk [vmem:[%s1060_s24 + $0x20] sm:$0xff] %vm656_vm1, %v666_v18 }
 0x1fa   : > { %v668_v19 = vpop.permute.xlu1 %667 }
 0x1fb   : > { %831 = vst.msk [vmem:[%s1060_s24 + $0x28] sm:$0xff] %vm656_vm1, %v668_v19 }
 0x26c   : > { %v898_v0 = vpop.f32.mrb[0].mxu1 }
 0x26d   : > { %836 = vst.msk [vmem:[%s1060_s24 + $0x50] sm:$0xff] %vm656_vm1, %v898_v0  ;;  %v637_v20 = vpop.f32.mrb[1].mxu1 }
 0x26e   : > { %834 = vst.msk [vmem:[%s1060_s24 + $0x40] sm:$0xff] %vm656_vm1, %v637_v20  ;;  %691 = vrot.lane.b32.xlu0 %v637_v20, %s970_s25  ;;  %v899_v21 = vpop.f32.mrb[2].mxu1 }
 0x26f   : > { %837 = vst.msk [vmem:[%s1060_s24 + $0x58] sm:$0xff] %vm656_vm1, %v899_v21  ;;  %v640_v22 = vpop.f32.mrb[3].mxu1 }
 0x270   : > { %835 = vst.msk [vmem:[%s1060_s24 + $0x48] sm:$0xff] %vm656_vm1, %v640_v22  ;;  %693 = vrot.lane.b32.xlu1 %v640_v22, %s970_s25 }
 0x272   : > { %695 = vrot.lane.b32.xlu0 %v898_v0, %s970_s25 }
 0x274   : > { %697 = vrot.lane.b32.xlu1 %v899_v21, %s970_s25 }
 0x2e0   : > { %v692_v23 = vpop.permute.xlu0 %691 }
 0x2e1   : > { %838 = vst.msk [vmem:[%s1060_s24 + $0x60] sm:$0xff] %vm656_vm1, %v692_v23 }
 0x2e2   : > { %v694_v24 = vpop.permute.xlu1 %693 }
 0x2e3   : > { %839 = vst.msk [vmem:[%s1060_s24 + $0x68] sm:$0xff] %vm656_vm1, %v694_v24 }
 0x2e4   : > { %v696_v25 = vpop.permute.xlu0 %695 }
 0x2e5   : > { %840 = vst.msk [vmem:[%s1060_s24 + $0x70] sm:$0xff] %vm656_vm1, %v696_v25 }
 0x2e6   : > { %v698_v26 = vpop.permute.xlu1 %697 }
 0x2e7   : > { %841 = vst.msk [vmem:[%s1060_s24 + $0x78] sm:$0xff] %vm656_vm1, %v698_v26 }
 0x2e8 PF: > { %s12_s11 = sadd.s32 1, %s966_s11   ;;  %s1122_s9 = smov %s962_s10 }
 0x2e9   : > { %p9_p5 = scmp.ge.s32.totalorder %s12_s11, 4   ;;  %s1123_s10 = smov %s1125_s12 }
 0x2eb   :  { %11 = sbr.rel (!%p9_p5) target bundleno = 2 (0x2), region = 61 }

</bundles_post_ra>
